<compile_context>
chip_gen: v5e
topology: v5e:2x2
jax: 0.10.0
libtpu: 0.0.40
codegen_flags: <defaults>
</compile_context>

<pallas_src>
from functools import partial

import jax
import jax.numpy as jnp
from jax.experimental import pallas as pl
from jax.experimental.pallas import tpu as pltpu


def _dalle2_kernel(x_ref, o_ref, *, scale, bias):
    # x_ref: (bn, C*crop*crop) uint8 pixel values in [0, 255]
    # o_ref: (bn, C*crop*crop) float32
    # ToTensor scaling + normalize fused into a single affine:
    #   o = ((image_max - image_min) / 255) * x + image_min
    o_ref[...] = x_ref[...].astype(jnp.float32) * scale + bias


def _tpu_generation():
    """Best-effort chip-generation probe (never raises)."""
    try:
        kind = jax.devices()[0].device_kind.lower()
    except Exception:
        return "unknown"
    if "v7" in kind:
        return "v7x"
    if "v6" in kind:
        return "v6e"
    if "v5" in kind:
        return "v5e"
    return "unknown"


# generation -> (TensorCores per chip, double-buffered VMEM budget, vmem_limit_bytes)
_GEN_PARAMS = {
    "v5e":     (1, 12 << 20, 24 << 20),   # 16 MiB default scoped / 128 MiB physical
    "v6e":     (1, 24 << 20, 48 << 20),   # 32 MiB default scoped / 128 MiB physical
    "v7x":     (2, 20 << 20, 32 << 20),   # 32 MiB default scoped /  64 MiB physical
    "unknown": (1,  8 << 20, None),
}


def _round_down_align(bn, n):
    """Floor bn to the u8/f32 sublane tile granularity (keep full-dim blocks)."""
    if bn >= n:
        return n
    if bn >= 32:
        return (bn // 32) * 32
    if bn >= 8:
        return (bn // 8) * 8
    return bn


def _pick_batch_block(n, lane_elems, num_tc, vmem_budget):
    """Images per grid step for the (bn, lane_elems) elementwise kernel."""
    if n <= 0:
        return 1
    per_image_bytes = lane_elems * (1 + 4)      # u8 in + f32 out, per image per step
    # VMEM cap: double-buffered input + output blocks must fit the budget.
    bn_vmem = max(1, vmem_budget // (2 * per_image_bytes))
    # HBM-roofline target: move ~>=2 MiB per grid step so the ~0.35us/step
    # overhead and small DMA chunks don't dominate a purely mem-bound kernel.
    bn_target = max(1, -(-(2 << 20) // per_image_bytes))
    bn = min(n, bn_target, bn_vmem)

    # Megacore (v7x only): if everything would fit in one step, split into two
    # (one step per TensorCore) only when each half still carries enough bytes
    # to be worth the exposed DMA of a 1-iteration pipeline.
    if num_tc >= 2 and bn >= n >= 2:
        half = n - n // 2                       # ceil(n/2) -> exactly 2 grid steps
        if half * per_image_bytes >= (512 << 10):
            aligned = (half + 7) // 8 * 8       # keep sublane alignment if it
            if 8 <= aligned <= min(n, bn_vmem) and -(-n // aligned) == 2:
                half = aligned                  # doesn't change the step count
            return max(1, half)
        return n                                # tiny N: one step, no split

    return max(1, _round_down_align(bn, n))


def dalle2_image_transform(images_nhwc, image_size=16, image_min=-1.0, image_max=1.0):
    """images_nhwc: (N, H, W, C) uint8 pixel values in [0, 255].

    Returns (N, C, image_size, image_size) float32, matching the PyTorch
    module's stacked output (minus the PIL resize step).
    """
    N, H, W, C = images_nhwc.shape
    crop = int(image_size)
    assert H >= crop and W >= crop, "inputs must already be at/above target resolution"

    # torchvision CenterCrop offsets (int(round(...)) -- matches tv.CenterCrop).
    top = int(round((H - crop) / 2.0))
    left = int(round((W - crop) / 2.0))

    # Crop window + ToTensor's HWC->CHW reorder on uint8 in the wrapper: one
    # small XLA copy over crop^2 pixels per image (no f32 expansion). Then
    # collapse C into the lane dim (metadata-only merge of contiguous dims) so
    # the kernel sees a lane-dense (N, C*crop^2) slab.
    x = images_nhwc[:, top:top + crop, left:left + crop, :]          # (N, crop, crop, C) u8
    x = jnp.transpose(x, (0, 3, 1, 2)).reshape(N, C * crop * crop)   # (N, C*crop^2) u8

    scale = (float(image_max) - float(image_min)) / 255.0
    bias = float(image_min)

    gen = _tpu_generation()
    num_tc, vmem_budget, vmem_limit = _GEN_PARAMS[gen]
    lane = C * crop * crop
    bn = _pick_batch_block(N, lane, num_tc, vmem_budget)
    grid = (pl.cdiv(N, bn),)

    out = pl.pallas_call(
        partial(_dalle2_kernel, scale=scale, bias=bias),
        out_shape=jax.ShapeDtypeStruct((N, lane), jnp.float32),
        grid=grid,
        # Last block dim equals the full array dim (lane-dense, multiple of 128
        # for C=3 and crop = 16/32/64); bn is sublane-aligned or equal to N.
        in_specs=[pl.BlockSpec((bn, lane), lambda i: (i, 0))],
        out_specs=pl.BlockSpec((bn, lane), lambda i: (i, 0)),
        compiler_params=pltpu.CompilerParams(
            dimension_semantics=("parallel",),
            vmem_limit_bytes=vmem_limit,
        ),
    )(x)

    # Contiguous split of the last dim: metadata-only.
    return out.reshape(N, C, crop, crop)


if __name__ == "__main__":
    key = jax.random.PRNGKey(0)
    # Batch of 2 RGB "already resized" images at 24x24, center-cropped to 16x16.
    N, H, W, C = 2, 24, 24, 3
    image_size = 16
    images = jax.random.randint(key, (N, H, W, C), 0, 256, dtype=jnp.int32).astype(jnp.uint8)

    out = dalle2_image_transform(images, image_size=image_size, image_min=-1.0, image_max=1.0)
    out = jax.block_until_ready(out)

    # Pure-JAX reference of the same (crop + ToTensor + normalize) pipeline.
    top = int(round((H - image_size) / 2.0))
    left = int(round((W - image_size) / 2.0))
    ref = images[:, top:top + image_size, left:left + image_size, :].astype(jnp.float32)
    ref = jnp.transpose(ref, (0, 3, 1, 2)) / 255.0
    ref = (1.0 - (-1.0)) * ref + (-1.0)

    assert out.shape == (N, C, image_size, image_size)
    assert out.dtype == jnp.float32
    assert jnp.max(jnp.abs(out - ref)) < 1e-5

    print("KERNEL_OK")
</pallas_src>

<mosaic_0001>
module attributes {stable_mosaic.version = 11 : i64} {
  func.func @_dalle2_kernel(%arg0: i32, %arg1: memref<2x768xi8, #tpu.memory_space<vmem>>, %arg2: memref<2x768xf32, #tpu.memory_space<vmem>>) attributes {dimension_semantics = [#tpu.dimension_semantics<parallel>], iteration_bounds = array<i64: 1>, scalar_prefetch = 0 : i64, scratch_operands = 0 : i64, tpu.core_type = #tpu.core_type<tc>, window_params = [{transform_indices = @transform_0, window_bounds = array<i64: 2, 768>}, {transform_indices = @transform_1, window_bounds = array<i64: 2, 768>}]} {
    %c0 = arith.constant 0 : index
    %c0_0 = arith.constant 0 : index
    %0 = vector.load %arg1[%c0, %c0_0] : memref<2x768xi8, #tpu.memory_space<vmem>>, vector<2x768xi8>
    %1 = arith.uitofp %0 : vector<2x768xi8> to vector<2x768xf32>
    %cst = arith.constant 0.00784313772 : f32
    %2 = vector.broadcast %cst : f32 to vector<2x768xf32>
    %3 = arith.mulf %1, %2 : vector<2x768xf32>
    %cst_1 = arith.constant -1.000000e+00 : f32
    %4 = vector.broadcast %cst_1 : f32 to vector<2x768xf32>
    %5 = arith.addf %3, %4 : vector<2x768xf32>
    %c0_2 = arith.constant 0 : index
    %c0_3 = arith.constant 0 : index
    %6 = vector.load %arg2[%c0_2, %c0_3] : memref<2x768xf32, #tpu.memory_space<vmem>>, vector<2x768xf32>
    tpu.vector_store %arg2[%c0_2, %c0_3], %5 {strides = array<i32>} : memref<2x768xf32, #tpu.memory_space<vmem>>, vector<2x768xf32>,
    return
  }
  func.func @transform_0(%arg0: i32) -> (i32, i32) {
    %c0_i32 = arith.constant 0 : i32
    %c0_i32_0 = arith.constant 0 : i32
    return %arg0, %c0_i32 : i32, i32
  }
  func.func @transform_1(%arg0: i32) -> (i32, i32) {
    %c0_i32 = arith.constant 0 : i32
    %c0_i32_0 = arith.constant 0 : i32
    return %arg0, %c0_i32 : i32, i32
  }
}

</mosaic_0001>

<bundles_post_ra>
// kernel: tpu_custom_call.1
= control target key start
LH: loop header
LB: loop body
LE: loop exit
PB: predicated region body
PF: predicated region fallthrough
CT: control target
= control target key end

     0   :  { %6 = vsyncpa [#allocation3], 0  ;;  %s146_s0 = inlined_call_operand.hbm [shape: u8[2,768], index: 0, kind: input, shape index: {}]   ;;  %s147_s1 = inlined_call_operand.hbm [shape: f32[2,768], index: 1, kind: output, shape index: {}]  }
   0x1   :  { %7 = vsyncpa [#allocation4], 0  ;;  %s13_s8 = sshll.u32 %s146_s0, 4  ;;  %s128_s9 = smov [#allocation2]   ;;  %s14_s8 = int_to_ptr.hbm [resolvable:$true] %s13_s8 }
   0x2   :  { %s15_s10 = sshll.u32 %s128_s9, 4  ;;  %s16_s10 = int_to_ptr.vmem [resolvable:$true] %s15_s10 }
   0x3   :  { %18 = dma.hbm_to_vmem [thread:$0]  %s14_s8, 96, %s16_s10, [#allocation3]  }
   0x4   :  { %124 = dma.done.wait [#allocation3], 96  }
   0x5   :  { %125 = vsyncadd [#allocation3], 4294967200  ;;  %v23_v0 = vld [vmem:[#allocation2] sm:$0x3f]  ;;  %vm46_vm0 = vcmask 1041408   ;;  %vm48_vm1 = vcmask 1045508  }
   0x6   :  { %v24_v1 = vunpack.c.0.s8 %v23_v0  ;;  %v25_v2 = vunpack.c.1.s8 %v23_v0  ;;  %v26_v3 = vunpack.c.2.s8 %v23_v0  ;;  %vm50_vm2 = vcmask 1043456   ;;  %s129_s0 = smov [#allocation5]   ;;  %s64_s14 = sshll.u32 %s147_s1, 4  ;;  %s65_s14 = int_to_ptr.hbm [resolvable:$true] %s64_s14 }
   0x7   :  { %s62_s11 = sshll.u32 %s129_s0, 4  ;;  %s63_s11 = int_to_ptr.vmem [resolvable:$true] %s62_s11 }
   0x8   :  { %v27_v4 = vand.u32 255, %v24_v1  ;;  %v28_v5 = vand.u32 255, %v25_v2  ;;  %v29_v6 = vand.u32 255, %v26_v3 }
   0xa   :  { %v30_v7 = vcvt.s32.f32 %v27_v4  ;;  %v31_v8 = vcvt.s32.f32 %v28_v5  ;;  %v32_v9 = vcvt.s32.f32 %v29_v6 }
   0xc   :  { %v33_v10 = vmul.f32 0.007843138, %v30_v7  ;;  %v34_v11 = vmul.f32 0.007843138, %v31_v8  ;;  %v35_v12 = vmul.f32 0.007843138, %v32_v9 }
   0xe   :  { %v36_v13 = vadd.f32 -1.0, %v33_v10  ;;  %v37_v14 = vadd.f32 -1.0, %v34_v11  ;;  %v38_v15 = vadd.f32 -1.0, %v35_v12 }
  0x10   :  { %v42_v16 = vrot.slane %v36_v13, 2  ;;  %v43_v17 = vrot.slane %v37_v14, 4  ;;  %v44_v18 = vrot.slane %v37_v14, 6  ;;  %v45_v19 = vrot.slane %v38_v15, 2 }
  0x12   :  { %v47_v20 = vsel %vm46_vm0, %v36_v13, %v42_v16  ;;  %v49_v21 = vsel %vm48_vm1, %v43_v17, %v44_v18  ;;  %v52_v22 = vsel %vm46_vm0, %v38_v15, %v45_v19 }
  0x13   :  { %v51_v23 = vsel %vm50_vm2, %v47_v20, %v49_v21  ;;  %56 = vst [vmem:[#allocation5 + $0x8] sm:$0xf] %v52_v22 }
  0x14   :  { %55 = vst [vmem:[#allocation5] sm:$0xff] %v51_v23 }
  0x15   :  { %67 = dma.vmem_to_hbm [thread:$0]  %s63_s11, 192, %s65_s14, [#allocation4]  }
  0x16   :  { %126 = dma.done.wait [#allocation4], 192  }
  0x17   :  { %127 = vsyncadd [#allocation4], 4294967104 }
  0x18   :  { %72 = vsyncpa [#allocation3], 1 }
  0x19   :  { %73 = vsyncpa [#allocation4], 1 }

</bundles_post_ra>
